<compile_context>
chip_gen: v6e
topology: v6e:2x2x1
jax: 0.10.0
libtpu: 0.0.40
codegen_flags: <defaults>
</compile_context>

<pallas_src>
import functools

import jax
import jax.numpy as jnp
from jax.experimental import pallas as pl
from jax.experimental.pallas import tpu as pltpu

LANE = 128   # TPU lane width; every feature dim is padded to a multiple of it


# ----------------------------- Pallas kernel --------------------------------

def _mlp_kernel(x_ref, w_ref, b_ref, out_ref, *, layer_specs):
    """One batch tile of the whole MLP.

    x_ref:   [TM, K0_pad]        bf16  (batch tile, zero-padded features)
    w_ref:   [sum(K_pad), N_max] bf16  (flat per-layer weight slab, resident)
    b_ref:   [n_layers, 1, N_max] f32  (bias slab, resident)
    out_ref: [TM, N_last_pad]    f32
    layer_specs: tuple of (row_offset, K_pad, N_pad) Python ints per layer.
    """
    n_layers = len(layer_specs)
    h = x_ref[...]                                       # bf16 [TM, K0_pad]
    for l, (off, kp, npad) in enumerate(layer_specs):    # static unroll (8)
        # Static, 128-aligned slices of the resident slabs -> layout-free.
        w = w_ref[off:off + kp, :npad]                   # bf16 [kp, npad]
        y = jnp.dot(h.astype(jnp.bfloat16), w,
                    preferred_element_type=jnp.float32)  # MXU, f32 accum
        y = y + b_ref[l, :, :npad]                       # f32 bias (v5e-safe)
        h = jnp.maximum(y, 0.0) if l < n_layers - 1 else y
    out_ref[...] = h                                     # full-lane f32 store


# ------------------------------ host wrapper ---------------------------------

def _round_up(x, m):
    return (x + m - 1) // m * m


def nn_model_forward(x, w_packed, b_packed, layer_specs, *, out_size,
                     tile_m=1024):
    """x: [B, input_size] f32.  Returns [B, out_size] f32."""
    B, d_in = x.shape
    n_layers = len(layer_specs)
    k0_pad = layer_specs[0][1]          # padded input width (128)
    f_out = layer_specs[-1][2]          # padded output width (128)
    total_k, n_max = w_packed.shape

    # Batch tile: <= tile_m, multiple of 8 sublanes, and chosen so the grid
    # has >= 2 steps whenever the batch allows it (v7x megacore needs >= 2).
    tm = min(tile_m, max(8, _round_up(-(-B // 2), 8)))
    B_pad = _round_up(B, tm)
    grid = (B_pad // tm,)

    # Lane-dense (128-wide), zero-padded bf16 input slab.
    x_pad = jnp.zeros((B_pad, k0_pad), jnp.bfloat16).at[:B, :d_in].set(
        x.astype(jnp.bfloat16))

    # Advisory cost estimate for the trimmed (padded-to-128) problem.
    flops = 2 * B_pad * sum(kp * npad for _, kp, npad in layer_specs)
    bytes_accessed = (x_pad.size * 2 + w_packed.size * 2
                      + b_packed.size * 4 + B_pad * f_out * 4)
    cost = pl.CostEstimate(flops=flops, transcendentals=0,
                           bytes_accessed=bytes_accessed)

    kernel = functools.partial(_mlp_kernel, layer_specs=layer_specs)

    out_pad = pl.pallas_call(
        kernel,
        out_shape=jax.ShapeDtypeStruct((B_pad, f_out), jnp.float32),
        grid=grid,
        in_specs=[
            # batch tile marches along the grid (double-buffered by Pallas)
            pl.BlockSpec((tm, k0_pad), lambda i: (i, 0)),
            # packed weights / biases: constant block index -> DMA'd once and
            # kept VMEM-resident (Pallas skips the copy on revisits).
            pl.BlockSpec((total_k, n_max), lambda i: (0, 0)),
            pl.BlockSpec((n_layers, 1, n_max), lambda i: (0, 0, 0)),
        ],
        out_specs=pl.BlockSpec((tm, f_out), lambda i: (i, 0)),
        compiler_params=pltpu.CompilerParams(
            dimension_semantics=("parallel",)),   # megacore on v7x
        cost_estimate=cost,
    )(x_pad, w_packed, b_packed)

    return out_pad[:B, :out_size]


# --------------------------- parameter setup ---------------------------------

def _orthogonal(key, shape):
    """Deterministic orthogonal init (like torch.nn.init.orthogonal_), returned
    already transposed to [in, out]."""
    out_f, in_f = shape  # torch weight shape
    a = jax.random.normal(key, (max(out_f, in_f), min(out_f, in_f)), jnp.float32)
    q, r = jnp.linalg.qr(a)
    q = q * jnp.sign(jnp.diagonal(r))
    if out_f < in_f:
        w = q.T[:out_f, :in_f]
    else:
        w = q[:out_f, :in_f]
    return w.T  # [in, out]


def _kaiming_linear(key, shape):
    """Default nn.Linear init (kaiming-uniform-ish), returned as [in, out]."""
    out_f, in_f = shape
    bound = 1.0 / jnp.sqrt(in_f)
    kw, kb = jax.random.split(key)
    w = jax.random.uniform(kw, (out_f, in_f), jnp.float32, -bound, bound)
    b = jax.random.uniform(kb, (out_f,), jnp.float32, -bound, bound)
    return w.T, b


def make_params(key, config):
    dims = [
        (config['input_size'], config['emb_size']),    # nn.Linear
        (config['emb_size'], config['hidden_size']),   # OrthoLinear
        (config['hidden_size'], 256),                  # OrthoLinear
        (256, 128),                                     # OrthoLinear
        (128, 64),                                      # OrthoLinear
        (64, 32),                                       # OrthoLinear
        (32, 32),                                       # OrthoLinear
        (32, config['output_size']),                    # nn.Linear (output)
    ]
    ortho = [False, True, True, True, True, True, True, False]
    keys = jax.random.split(key, len(dims))
    params = []
    for (d_in, d_out), is_ortho, k in zip(dims, ortho, keys):
        if is_ortho:
            w = _orthogonal(k, (d_out, d_in))
            b = jnp.zeros((d_out,), jnp.float32)
        else:
            w, b = _kaiming_linear(k, (d_out, d_in))
        params.append((w.astype(jnp.float32), b.astype(jnp.float32)))
    return params


def pack_params(params):
    """Pack the 8 (W[in,out], b[out]) pairs into one flat bf16 weight slab
    [sum(K_pad), N_max] and one f32 bias slab [n_layers, 1, N_max], where each
    layer's dims are rounded up to 128. Returns (w_packed, b_packed,
    layer_specs) with layer_specs[l] = (row_offset, K_pad, N_pad)."""
    n_layers = len(params)
    kpads = [_round_up(w.shape[0], LANE) for w, _ in params]
    npads = [_round_up(w.shape[1], LANE) for w, _ in params]
    n_max = max(npads)
    total_k = sum(kpads)

    w_packed = jnp.zeros((total_k, n_max), jnp.bfloat16)
    b_packed = jnp.zeros((n_layers, 1, n_max), jnp.float32)
    layer_specs = []
    off = 0
    for l, ((w, b), kp, npad) in enumerate(zip(params, kpads, npads)):
        d_in, d_out = w.shape
        w_packed = w_packed.at[off:off + d_in, :d_out].set(
            w.astype(jnp.bfloat16))
        b_packed = b_packed.at[l, 0, :d_out].set(b)
        layer_specs.append((off, kp, npad))
        off += kp
    return w_packed, b_packed, tuple(layer_specs)


# --------------------------- pure-JAX reference -------------------------------

def reference_forward(x, params):
    """Same math (bf16 weights/activations, f32 accumulation) without Pallas."""
    h = x.astype(jnp.float32)
    for i, (w, b) in enumerate(params):
        y = jnp.dot(h.astype(jnp.bfloat16), w.astype(jnp.bfloat16),
                    preferred_element_type=jnp.float32) + b[None, :]
        h = jnp.maximum(y, 0.0) if i < len(params) - 1 else y
    return h


# --------------------------------- main ---------------------------------------

if __name__ == "__main__":
    config = {
        'loss_fxn': 'cross_entropy',
        'input_size': 32,
        'emb_size': 64,
        'hidden_size': 128,
        'output_size': 8,
    }
    batch = 8

    key = jax.random.PRNGKey(0)
    kx, kp = jax.random.split(key)
    x = jax.random.normal(kx, (batch, config['input_size']), jnp.float32)

    params = make_params(kp, config)
    w_packed, b_packed, layer_specs = pack_params(params)

    out = nn_model_forward(x, w_packed, b_packed, layer_specs,
                           out_size=config['output_size'])
    jax.block_until_ready(out)
    assert out.shape == (batch, config['output_size'])

    # Sanity check against a pure-JAX reference using identical bf16 math.
    ref = reference_forward(x, params)
    assert jnp.allclose(out, ref, rtol=2e-2, atol=2e-2), "mismatch vs reference"

    print("KERNEL_OK")
</pallas_src>

<mosaic_0001>
module attributes {stable_mosaic.version = 11 : i64} {
  func.func @_mlp_kernel(%arg0: i32, %arg1: memref<8x128xbf16, #tpu.memory_space<vmem>>, %arg2: memref<1152x256xbf16, #tpu.memory_space<vmem>>, %arg3: memref<8x1x256xf32, #tpu.memory_space<vmem>>, %arg4: memref<8x128xf32, #tpu.memory_space<vmem>>) attributes {dimension_semantics = [#tpu.dimension_semantics<parallel>], iteration_bounds = array<i64: 1>, scalar_prefetch = 0 : i64, scratch_operands = 0 : i64, tpu.core_type = #tpu.core_type<tc>, window_params = [{transform_indices = @transform_0, window_bounds = array<i64: 8, 128>}, {pipeline_mode = #tpu.pipeline_mode<synchronous>, transform_indices = @transform_1, window_bounds = array<i64: 1152, 256>}, {pipeline_mode = #tpu.pipeline_mode<synchronous>, transform_indices = @transform_2, window_bounds = array<i64: 8, 1, 256>}, {transform_indices = @transform_3, window_bounds = array<i64: 8, 128>}]} {
    %c0 = arith.constant 0 : index
    %c0_0 = arith.constant 0 : index
    %0 = vector.load %arg1[%c0, %c0_0] : memref<8x128xbf16, #tpu.memory_space<vmem>>, vector<8x128xbf16>
    %c0_1 = arith.constant 0 : index
    %c0_2 = arith.constant 0 : index
    %1 = vector.load %arg2[%c0_1, %c0_2] : memref<1152x256xbf16, #tpu.memory_space<vmem>>, vector<128x128xbf16>
    %cst = arith.constant dense<0.000000e+00> : vector<8x128xf32>
    %2 = tpu.matmul %0, %1, %cst {dimension_numbers = #tpu.dot_dimension_numbers<[1], [0], [0], [1], [0, 0, 1, 1], [], []>} : vector<8x128xbf16>, vector<128x128xbf16>, vector<8x128xf32> -> vector<8x128xf32>
    %c0_3 = arith.constant 0 : index
    %c0_4 = arith.constant 0 : index
    %c0_5 = arith.constant 0 : index
    %3 = vector.load %arg3[%c0_3, %c0_4, %c0_5] : memref<8x1x256xf32, #tpu.memory_space<vmem>>, vector<1x1x128xf32>
    %4 = vector.shape_cast %3 : vector<1x1x128xf32> to vector<1x128xf32>
    %5 = vector.broadcast %4 : vector<1x128xf32> to vector<8x128xf32>
    %6 = arith.addf %2, %5 : vector<8x128xf32>
    %cst_6 = arith.constant 0.000000e+00 : f32
    %7 = vector.broadcast %cst_6 : f32 to vector<8x128xf32>
    %8 = arith.maximumf %6, %7 : vector<8x128xf32>
    %c128 = arith.constant 128 : index
    %c0_7 = arith.constant 0 : index
    %9 = vector.load %arg2[%c128, %c0_7] : memref<1152x256xbf16, #tpu.memory_space<vmem>>, vector<128x128xbf16>
    %10 = arith.truncf %8 : vector<8x128xf32> to vector<8x128xbf16>
    %cst_8 = arith.constant dense<0.000000e+00> : vector<8x128xf32>
    %11 = tpu.matmul %10, %9, %cst_8 {dimension_numbers = #tpu.dot_dimension_numbers<[1], [0], [0], [1], [0, 0, 1, 1], [], []>} : vector<8x128xbf16>, vector<128x128xbf16>, vector<8x128xf32> -> vector<8x128xf32>
    %c1 = arith.constant 1 : index
    %c0_9 = arith.constant 0 : index
    %c0_10 = arith.constant 0 : index
    %12 = vector.load %arg3[%c1, %c0_9, %c0_10] : memref<8x1x256xf32, #tpu.memory_space<vmem>>, vector<1x1x128xf32>
    %13 = vector.shape_cast %12 : vector<1x1x128xf32> to vector<1x128xf32>
    %14 = vector.broadcast %13 : vector<1x128xf32> to vector<8x128xf32>
    %15 = arith.addf %11, %14 : vector<8x128xf32>
    %cst_11 = arith.constant 0.000000e+00 : f32
    %16 = vector.broadcast %cst_11 : f32 to vector<8x128xf32>
    %17 = arith.maximumf %15, %16 : vector<8x128xf32>
    %c256 = arith.constant 256 : index
    %c0_12 = arith.constant 0 : index
    %18 = vector.load %arg2[%c256, %c0_12] : memref<1152x256xbf16, #tpu.memory_space<vmem>>, vector<128x256xbf16>
    %19 = arith.truncf %17 : vector<8x128xf32> to vector<8x128xbf16>
    %cst_13 = arith.constant dense<0.000000e+00> : vector<8x256xf32>
    %20 = tpu.matmul %19, %18, %cst_13 {dimension_numbers = #tpu.dot_dimension_numbers<[1], [0], [0], [1], [0, 0, 1, 1], [], []>} : vector<8x128xbf16>, vector<128x256xbf16>, vector<8x256xf32> -> vector<8x256xf32>
    %c2 = arith.constant 2 : index
    %c0_14 = arith.constant 0 : index
    %c0_15 = arith.constant 0 : index
    %21 = vector.load %arg3[%c2, %c0_14, %c0_15] : memref<8x1x256xf32, #tpu.memory_space<vmem>>, vector<1x1x256xf32>
    %22 = vector.shape_cast %21 : vector<1x1x256xf32> to vector<1x256xf32>
    %23 = vector.broadcast %22 : vector<1x256xf32> to vector<8x256xf32>
    %24 = arith.addf %20, %23 : vector<8x256xf32>
    %cst_16 = arith.constant 0.000000e+00 : f32
    %25 = vector.broadcast %cst_16 : f32 to vector<8x256xf32>
    %26 = arith.maximumf %24, %25 : vector<8x256xf32>
    %c384 = arith.constant 384 : index
    %c0_17 = arith.constant 0 : index
    %27 = vector.load %arg2[%c384, %c0_17] : memref<1152x256xbf16, #tpu.memory_space<vmem>>, vector<256x128xbf16>
    %28 = arith.truncf %26 : vector<8x256xf32> to vector<8x256xbf16>
    %cst_18 = arith.constant dense<0.000000e+00> : vector<8x128xf32>
    %29 = tpu.matmul %28, %27, %cst_18 {dimension_numbers = #tpu.dot_dimension_numbers<[1], [0], [0], [1], [0, 0, 1, 1], [], []>} : vector<8x256xbf16>, vector<256x128xbf16>, vector<8x128xf32> -> vector<8x128xf32>
    %c3 = arith.constant 3 : index
    %c0_19 = arith.constant 0 : index
    %c0_20 = arith.constant 0 : index
    %30 = vector.load %arg3[%c3, %c0_19, %c0_20] : memref<8x1x256xf32, #tpu.memory_space<vmem>>, vector<1x1x128xf32>
    %31 = vector.shape_cast %30 : vector<1x1x128xf32> to vector<1x128xf32>
    %32 = vector.broadcast %31 : vector<1x128xf32> to vector<8x128xf32>
    %33 = arith.addf %29, %32 : vector<8x128xf32>
    %cst_21 = arith.constant 0.000000e+00 : f32
    %34 = vector.broadcast %cst_21 : f32 to vector<8x128xf32>
    %35 = arith.maximumf %33, %34 : vector<8x128xf32>
    %c640 = arith.constant 640 : index
    %c0_22 = arith.constant 0 : index
    %36 = vector.load %arg2[%c640, %c0_22] : memref<1152x256xbf16, #tpu.memory_space<vmem>>, vector<128x128xbf16>
    %37 = arith.truncf %35 : vector<8x128xf32> to vector<8x128xbf16>
    %cst_23 = arith.constant dense<0.000000e+00> : vector<8x128xf32>
    %38 = tpu.matmul %37, %36, %cst_23 {dimension_numbers = #tpu.dot_dimension_numbers<[1], [0], [0], [1], [0, 0, 1, 1], [], []>} : vector<8x128xbf16>, vector<128x128xbf16>, vector<8x128xf32> -> vector<8x128xf32>
    %c4 = arith.constant 4 : index
    %c0_24 = arith.constant 0 : index
    %c0_25 = arith.constant 0 : index
    %39 = vector.load %arg3[%c4, %c0_24, %c0_25] : memref<8x1x256xf32, #tpu.memory_space<vmem>>, vector<1x1x128xf32>
    %40 = vector.shape_cast %39 : vector<1x1x128xf32> to vector<1x128xf32>
    %41 = vector.broadcast %40 : vector<1x128xf32> to vector<8x128xf32>
    %42 = arith.addf %38, %41 : vector<8x128xf32>
    %cst_26 = arith.constant 0.000000e+00 : f32
    %43 = vector.broadcast %cst_26 : f32 to vector<8x128xf32>
    %44 = arith.maximumf %42, %43 : vector<8x128xf32>
    %c768 = arith.constant 768 : index
    %c0_27 = arith.constant 0 : index
    %45 = vector.load %arg2[%c768, %c0_27] : memref<1152x256xbf16, #tpu.memory_space<vmem>>, vector<128x128xbf16>
    %46 = arith.truncf %44 : vector<8x128xf32> to vector<8x128xbf16>
    %cst_28 = arith.constant dense<0.000000e+00> : vector<8x128xf32>
    %47 = tpu.matmul %46, %45, %cst_28 {dimension_numbers = #tpu.dot_dimension_numbers<[1], [0], [0], [1], [0, 0, 1, 1], [], []>} : vector<8x128xbf16>, vector<128x128xbf16>, vector<8x128xf32> -> vector<8x128xf32>
    %c5 = arith.constant 5 : index
    %c0_29 = arith.constant 0 : index
    %c0_30 = arith.constant 0 : index
    %48 = vector.load %arg3[%c5, %c0_29, %c0_30] : memref<8x1x256xf32, #tpu.memory_space<vmem>>, vector<1x1x128xf32>
    %49 = vector.shape_cast %48 : vector<1x1x128xf32> to vector<1x128xf32>
    %50 = vector.broadcast %49 : vector<1x128xf32> to vector<8x128xf32>
    %51 = arith.addf %47, %50 : vector<8x128xf32>
    %cst_31 = arith.constant 0.000000e+00 : f32
    %52 = vector.broadcast %cst_31 : f32 to vector<8x128xf32>
    %53 = arith.maximumf %51, %52 : vector<8x128xf32>
    %c896 = arith.constant 896 : index
    %c0_32 = arith.constant 0 : index
    %54 = vector.load %arg2[%c896, %c0_32] : memref<1152x256xbf16, #tpu.memory_space<vmem>>, vector<128x128xbf16>
    %55 = arith.truncf %53 : vector<8x128xf32> to vector<8x128xbf16>
    %cst_33 = arith.constant dense<0.000000e+00> : vector<8x128xf32>
    %56 = tpu.matmul %55, %54, %cst_33 {dimension_numbers = #tpu.dot_dimension_numbers<[1], [0], [0], [1], [0, 0, 1, 1], [], []>} : vector<8x128xbf16>, vector<128x128xbf16>, vector<8x128xf32> -> vector<8x128xf32>
    %c6 = arith.constant 6 : index
    %c0_34 = arith.constant 0 : index
    %c0_35 = arith.constant 0 : index
    %57 = vector.load %arg3[%c6, %c0_34, %c0_35] : memref<8x1x256xf32, #tpu.memory_space<vmem>>, vector<1x1x128xf32>
    %58 = vector.shape_cast %57 : vector<1x1x128xf32> to vector<1x128xf32>
    %59 = vector.broadcast %58 : vector<1x128xf32> to vector<8x128xf32>
    %60 = arith.addf %56, %59 : vector<8x128xf32>
    %cst_36 = arith.constant 0.000000e+00 : f32
    %61 = vector.broadcast %cst_36 : f32 to vector<8x128xf32>
    %62 = arith.maximumf %60, %61 : vector<8x128xf32>
    %c1024 = arith.constant 1024 : index
    %c0_37 = arith.constant 0 : index
    %63 = vector.load %arg2[%c1024, %c0_37] : memref<1152x256xbf16, #tpu.memory_space<vmem>>, vector<128x128xbf16>
    %64 = arith.truncf %62 : vector<8x128xf32> to vector<8x128xbf16>
    %cst_38 = arith.constant dense<0.000000e+00> : vector<8x128xf32>
    %65 = tpu.matmul %64, %63, %cst_38 {dimension_numbers = #tpu.dot_dimension_numbers<[1], [0], [0], [1], [0, 0, 1, 1], [], []>} : vector<8x128xbf16>, vector<128x128xbf16>, vector<8x128xf32> -> vector<8x128xf32>
    %c7 = arith.constant 7 : index
    %c0_39 = arith.constant 0 : index
    %c0_40 = arith.constant 0 : index
    %66 = vector.load %arg3[%c7, %c0_39, %c0_40] : memref<8x1x256xf32, #tpu.memory_space<vmem>>, vector<1x1x128xf32>
    %67 = vector.shape_cast %66 : vector<1x1x128xf32> to vector<1x128xf32>
    %68 = vector.broadcast %67 : vector<1x128xf32> to vector<8x128xf32>
    %69 = arith.addf %65, %68 : vector<8x128xf32>
    %c0_41 = arith.constant 0 : index
    %c0_42 = arith.constant 0 : index
    %70 = vector.load %arg4[%c0_41, %c0_42] : memref<8x128xf32, #tpu.memory_space<vmem>>, vector<8x128xf32>
    tpu.vector_store %arg4[%c0_41, %c0_42], %69 {strides = array<i32>} : memref<8x128xf32, #tpu.memory_space<vmem>>, vector<8x128xf32>,
    return
  }
  func.func @transform_0(%arg0: i32) -> (i32, i32) {
    %c0_i32 = arith.constant 0 : i32
    %c0_i32_0 = arith.constant 0 : i32
    return %arg0, %c0_i32 : i32, i32
  }
  func.func @transform_1(%arg0: i32) -> (i32, i32) {
    %c0_i32 = arith.constant 0 : i32
    %c0_i32_0 = arith.constant 0 : i32
    %c0_i32_1 = arith.constant 0 : i32
    return %c0_i32, %c0_i32_0 : i32, i32
  }
  func.func @transform_2(%arg0: i32) -> (i32, i32, i32) {
    %c0_i32 = arith.constant 0 : i32
    %c0_i32_0 = arith.constant 0 : i32
    %c0_i32_1 = arith.constant 0 : i32
    %c0_i32_2 = arith.constant 0 : i32
    return %c0_i32, %c0_i32_0, %c0_i32_1 : i32, i32, i32
  }
  func.func @transform_3(%arg0: i32) -> (i32, i32) {
    %c0_i32 = arith.constant 0 : i32
    %c0_i32_0 = arith.constant 0 : i32
    return %arg0, %c0_i32 : i32, i32
  }
}

</mosaic_0001>

<bundles_post_ra>
// kernel: tpu_custom_call.1
= control target key start
LH: loop header
LB: loop body
LE: loop exit
PB: predicated region body
PF: predicated region fallthrough
CT: control target
= control target key end

     0   :  { %8 = vsyncpa [#allocation3], 0  ;;  %s1657_s0 = inlined_call_operand.hbm [shape: bf16[8,128], index: 0, kind: input, shape index: {}]   ;;  %s1658_s1 = inlined_call_operand.hbm [shape: bf16[1152,256], index: 1, kind: input, shape index: {}]   ;;  %s1659_s2 = inlined_call_operand.hbm [shape: f32[8,1,256], index: 2, kind: input, shape index: {}]   ;;  %s1660_s3 = inlined_call_operand.hbm [shape: f32[8,128], index: 3, kind: output, shape index: {}]  }
   0x1   :  { %9 = vsyncpa [#allocation6], 0 }
   0x2   :  { %10 = vsyncpa [#allocation4], 0  ;;  %s1554_s12 = smov [#allocation5]  }
   0x3   :  { %s26_s13 = sshll.u32 %s1554_s12, 4  ;;  %s27_s13 = int_to_ptr.vmem [resolvable:$true] %s26_s13 }
   0x4   :  { %s1476_s14 = scalar_lea.vmem %s27_s13, 18432  ;;  %p1481_p1 = scmp.lt.s32.totalorder %s27_s13, %s27_s13 }
   0x5   :  { %p1477_p0 = scmp.ne.s32.totalorder %s27_s13, %s1476_s14  ;;  %p1482_p2 = scmp.lt.s32.totalorder %s1476_s14, %s1476_s14 }
   0x7   :  { %p1483_p3 = por %p1482_p2, %p1481_p1 }
   0x9   :  { %p1484_p4 = pnand %p1483_p3, %p1477_p0 }
   0xb   :  { %1487 = shalt.err (!%p1484_p4)
}
   0xc   :  { %s1555_s15 = smov 128   ;;  %s1556_s16 = smov 8  }
   0xd   :  { %32 = dma.hbm_to_vmem [thread:$0]  %s1658_s1, 18432, %s27_s13, [#allocation6], %s1555_s15, %s1555_s15, %s1556_s16  }
   0xe   :  { %s1557_s19 = smov [#allocation2]   ;;  %s1558_s21 = smov [#allocation7]  }
   0xf   :  { %s17_s20 = sshll.u32 %s1557_s19, 4  ;;  %s38_s22 = sshll.u32 %s1558_s21, 4  ;;  %s18_s20 = int_to_ptr.vmem [resolvable:$true] %s17_s20  ;;  %s39_s22 = int_to_ptr.vmem [resolvable:$true] %s38_s22 }
  0x10   :  { %s1496_s23 = scalar_lea.vmem %s18_s20, 64  ;;  %p1501_p6 = scmp.lt.s32.totalorder %s18_s20, %s18_s20 }
  0x11   :  { %p1497_p5 = scmp.ne.s32.totalorder %s18_s20, %s1496_s23  ;;  %p1502_p7 = scmp.lt.s32.totalorder %s1496_s23, %s1496_s23 }
  0x13   :  { %p1503_p8 = por %p1502_p7, %p1501_p6 }
  0x15   :  { %p1504_p9 = pnand %p1503_p8, %p1497_p5 }
  0x17   :  { %1507 = shalt.err (!%p1504_p9)
}
  0x18   :  { %20 = dma.hbm_to_vmem [thread:$0]  %s1657_s0, 64, %s18_s20, [#allocation3]  }
  0x19   :  { %s1516_s26 = scalar_lea.vmem %s39_s22, 256  ;;  %p1521_p11 = scmp.lt.s32.totalorder %s39_s22, %s39_s22 }
  0x1a   :  { %p1517_p10 = scmp.ne.s32.totalorder %s39_s22, %s1516_s26  ;;  %p1522_p12 = scmp.lt.s32.totalorder %s1516_s26, %s1516_s26 }
  0x1c   :  { %p1523_p13 = por %p1522_p12, %p1521_p11 }
  0x1e   :  { %p1524_p0 = pnand %p1523_p13, %p1517_p10 }
  0x20   :  { %1527 = shalt.err (!%p1524_p0)
}
  0x21   :  { %s1559_s1 = smov 32   ;;  %s1560_s27 = smov 2  }
  0x22   :  { %44 = dma.hbm_to_vmem [thread:$0]  %s1659_s2, 256, %s39_s22, [#allocation6], %s1559_s1, %s1559_s1, %s1560_s27  }
  0x23   :  { %1548 = dma.done.wait [#allocation3], 64  }
  0x24   :  { %1549 = vsyncadd [#allocation3], 4294967232 }
  0x25   :  { %1550 = dma.done.wait [#allocation6], 18688  }
  0x26   :  { %1551 = vsyncadd [#allocation6], 4294948608  ;;  %v1561_v0 = vmov 0.0   ;;  %vm1562_vm0 = vmmov 0   ;;  %v1380_v1 = vld [vmem:[#allocation5 + $0x70] ss:$8 sps:$4 sm:$0xff]  }
  0x27   :  { %1249 = vmatprep.subr.bf16.mxu0 %v1561_v0  ;;  %1265 = vmatprep.mubr.msk.bf16.mxu0 %vm1562_vm0, %v1561_v0  ;;  %v1381_v2 = vld [vmem:[#allocation5 + $0x60] ss:$8 sps:$4 sm:$0xff]   ;;  %v1382_v3 = vld [vmem:[#allocation5 + $0x50] ss:$8 sps:$4 sm:$0xff]   ;;  %v55_v15 = vld [vmem:[#allocation2] sm:$0xf] }
  0x28   :  { %1269 = vmatprep.subr.bf16.mxu1 %v1561_v0  ;;  %1285 = vmatprep.mubr.msk.bf16.mxu1 %vm1562_vm0, %v1561_v0  ;;  %v1388_v4 = vld [vmem:[#allocation5 + $0xf0] ss:$8 sps:$4 sm:$0xff]   ;;  %v1383_v5 = vld [vmem:[#allocation5 + $0x40] ss:$8 sps:$4 sm:$0xff]   ;;  %v1398_v19 = vld [vmem:[#allocation5 + $0x174] ss:$8 sps:$4 sm:$0xff]  }
  0x29   :  { %1250 = vmatpush3.bf16.msra.mxu0 %v1380_v1  ;;  %1270 = vmatpush3.bf16.msra.mxu1 %v1388_v4  ;;  %v1389_v6 = vld [vmem:[#allocation5 + $0xe0] ss:$8 sps:$4 sm:$0xff]   ;;  %v1384_v7 = vld [vmem:[#allocation5 + $0x30] ss:$8 sps:$4 sm:$0xff]   ;;  %v1401_v20 = vld [vmem:[#allocation5 + $0x164] ss:$8 sps:$4 sm:$0xff]  }
  0x2a   :  { %1251 = vmatprep.subr.bf16.mxu0 %v1561_v0  ;;  %1271 = vmatprep.subr.bf16.mxu1 %v1561_v0  ;;  %v1390_v8 = vld [vmem:[#allocation5 + $0xd0] ss:$8 sps:$4 sm:$0xff]   ;;  %v1385_v9 = vld [vmem:[#allocation5 + $0x20] ss:$8 sps:$4 sm:$0xff]   ;;  %v1404_v22 = vld [vmem:[#allocation5 + $0x154] ss:$8 sps:$4 sm:$0xff]  }
  0x2b   :  { %v1391_v10 = vld [vmem:[#allocation5 + $0xc0] ss:$8 sps:$4 sm:$0xff]   ;;  %v1386_v11 = vld [vmem:[#allocation5 + $0x10] ss:$8 sps:$4 sm:$0xff]   ;;  %v1407_v24 = vld [vmem:[#allocation5 + $0x144] ss:$8 sps:$4 sm:$0xff]  }
  0x2c   :  { %v1392_v12 = vld [vmem:[#allocation5 + $0xb0] ss:$8 sps:$4 sm:$0xff]   ;;  %v1387_v13 = vld [vmem:[#allocation5] ss:$8 sps:$4 sm:$0xff]   ;;  %v1410_v26 = vld [vmem:[#allocation5 + $0x134] ss:$8 sps:$4 sm:$0xff]  }
  0x2d   :  { %1252 = vmatpush3.bf16.msra.mxu0 %v1381_v2  ;;  %1272 = vmatpush3.bf16.msra.mxu1 %v1389_v6  ;;  %v1393_v14 = vld [vmem:[#allocation5 + $0xa0] ss:$8 sps:$4 sm:$0xff]   ;;  %v1394_v16 = vld [vmem:[#allocation5 + $0x90] ss:$8 sps:$4 sm:$0xff]   ;;  %v1413_v28 = vld [vmem:[#allocation5 + $0x124] ss:$8 sps:$4 sm:$0xff]  }
  0x2e   :  { %1253 = vmatprep.subr.bf16.mxu0 %v1561_v0  ;;  %1273 = vmatprep.subr.bf16.mxu1 %v1561_v0  ;;  %v1395_v17 = vld [vmem:[#allocation5 + $0x80] ss:$8 sps:$4 sm:$0xff]   ;;  %v1396_v18 = vld [vmem:[#allocation5 + $0x170] ss:$8 sps:$4 sm:$0xff]   ;;  %v1416_v30 = vld [vmem:[#allocation5 + $0x114] ss:$8 sps:$4 sm:$0xff]  }
  0x2f   :  { %v1399_v21 = vld [vmem:[#allocation5 + $0x160] ss:$8 sps:$4 sm:$0xff]   ;;  %v1402_v23 = vld [vmem:[#allocation5 + $0x150] ss:$8 sps:$4 sm:$0xff]   ;;  %v1419_v40 = vld [vmem:[#allocation5 + $0x104] ss:$8 sps:$4 sm:$0xff]  }
  0x30   :  { %v1405_v25 = vld [vmem:[#allocation5 + $0x140] ss:$8 sps:$4 sm:$0xff]   ;;  %v1408_v27 = vld [vmem:[#allocation5 + $0x130] ss:$8 sps:$4 sm:$0xff]   ;;  %v1563_v42 = vmov 0   ;;  %s1564_s0 = smov [#allocation8]  }
  0x31   :  { %1254 = vmatpush3.bf16.msra.mxu0 %v1382_v3  ;;  %1274 = vmatpush3.bf16.msra.mxu1 %v1390_v8  ;;  %v1411_v29 = vld [vmem:[#allocation5 + $0x120] ss:$8 sps:$4 sm:$0xff]   ;;  %v1414_v31 = vld [vmem:[#allocation5 + $0x110] ss:$8 sps:$4 sm:$0xff]   ;;  %s1076_s2 = sshll.u32 %s1564_s0, 4  ;;  %s1077_s2 = int_to_ptr.vmem [resolvable:$true] %s1076_s2 }
  0x32   :  { %1255 = vmatprep.subr.bf16.mxu0 %v1561_v0  ;;  %1275 = vmatprep.subr.bf16.mxu1 %v1561_v0  ;;  %v1086_v32 = vld [vmem:[#allocation7] ss:$0 sm:$0xff]  ;;  %v1420_v43 = vld [vmem:[#allocation5 + $0x270] ss:$8 sps:$4 sm:$0xff]   ;;  %v1095_v55 = vld [vmem:[#allocation7 + $0x2] ss:$0 sm:$0xff]  ;;  %p1533_p2 = scmp.lt.s32.totalorder %s1077_s2, %s1077_s2 }
  0x33   :  { %v1417_v41 = vld [vmem:[#allocation5 + $0x100] ss:$8 sps:$4 sm:$0xff]   ;;  %v1421_v44 = vld [vmem:[#allocation5 + $0x1f0] ss:$8 sps:$4 sm:$0xff]   ;;  %s1528_s30 = scalar_lea.vmem %s1077_s2, 128 }
  0x34   :  { %v1422_v45 = vld [vmem:[#allocation5 + $0x260] ss:$8 sps:$4 sm:$0xff]   ;;  %v1424_v47 = vld [vmem:[#allocation5 + $0x250] ss:$8 sps:$4 sm:$0xff]   ;;  %p1529_p1 = scmp.ne.s32.totalorder %s1077_s2, %s1528_s30  ;;  %p1534_p3 = scmp.lt.s32.totalorder %s1528_s30, %s1528_s30 }
  0x35   :  { %1256 = vmatpush3.bf16.msra.mxu0 %v1383_v5  ;;  %1276 = vmatpush3.bf16.msra.mxu1 %v1391_v10  ;;  %v1423_v46 = vld [vmem:[#allocation5 + $0x1e0] ss:$8 sps:$4 sm:$0xff]   ;;  %v1425_v48 = vld [vmem:[#allocation5 + $0x1d0] ss:$8 sps:$4 sm:$0xff]  }
  0x36   :  { %1257 = vmatprep.subr.bf16.mxu0 %v1561_v0  ;;  %1277 = vmatprep.subr.bf16.mxu1 %v1561_v0  ;;  %v1426_v49 = vld [vmem:[#allocation5 + $0x240] ss:$8 sps:$4 sm:$0xff]   ;;  %v1428_v51 = vld [vmem:[#allocation5 + $0x230] ss:$8 sps:$4 sm:$0xff]   ;;  %p1535_p4 = por %p1534_p3, %p1533_p2 }
  0x37   :  { %v1427_v50 = vld [vmem:[#allocation5 + $0x1c0] ss:$8 sps:$4 sm:$0xff]   ;;  %v1429_v52 = vld [vmem:[#allocation5 + $0x1b0] ss:$8 sps:$4 sm:$0xff]  }
  0x38   :  { %v1430_v53 = vld [vmem:[#allocation5 + $0x220] ss:$8 sps:$4 sm:$0xff]   ;;  %v1432_v63 = vld [vmem:[#allocation5 + $0x210] ss:$8 sps:$4 sm:$0xff]   ;;  %p1536_p5 = pnand %p1535_p4, %p1529_p1 }
  0x39   :  { %1258 = vmatpush3.bf16.msra.mxu0 %v1384_v7  ;;  %1278 = vmatpush3.bf16.msra.mxu1 %v1392_v12  ;;  %v1431_v54 = vld [vmem:[#allocation5 + $0x1a0] ss:$8 sps:$4 sm:$0xff]   ;;  %v1433_v1 = vld [vmem:[#allocation5 + $0x190] ss:$8 sps:$4 sm:$0xff]   ;;  %v300_v12 = vld [vmem:[#allocation7 + $0x4] sm:$0x3] }
  0x3a   :  { %1259 = vmatprep.subr.bf16.mxu0 %v1561_v0  ;;  %1279 = vmatprep.subr.bf16.mxu1 %v1561_v0  ;;  %v1434_v2 = vld [vmem:[#allocation5 + $0x200] ss:$8 sps:$4 sm:$0xff]   ;;  %v1436_v4 = vld [vmem:[#allocation5 + $0x2f0] ss:$8 sps:$4 sm:$0xff]  }
  0x3b   :  { %v1435_v3 = vld [vmem:[#allocation5 + $0x180] ss:$8 sps:$4 sm:$0xff]   ;;  %v1438_v6 = vld [vmem:[#allocation5 + $0x2d0] ss:$8 sps:$4 sm:$0xff]  }
  0x3c   :  { %v1437_v5 = vld [vmem:[#allocation5 + $0x2e0] ss:$8 sps:$4 sm:$0xff]   ;;  %v1440_v8 = vld [vmem:[#allocation5 + $0x2b0] ss:$8 sps:$4 sm:$0xff]  }
  0x3d   :  { %1260 = vmatpush3.bf16.msra.mxu0 %v1385_v9  ;;  %1280 = vmatpush3.bf16.msra.mxu1 %v1393_v14  ;;  %v1439_v7 = vld [vmem:[#allocation5 + $0x2c0] ss:$8 sps:$4 sm:$0xff]   ;;  %v302_v9 = vlaneseq }
  0x3e   :  { %1261 = vmatprep.subr.bf16.mxu0 %v1561_v0  ;;  %1281 = vmatprep.subr.bf16.mxu1 %v1561_v0 }
  0x3f   :  { %v303_v10 = vshrl.u32 %v302_v9, 7 }
  0x41   :  { %1262 = vmatpush3.bf16.msra.mxu0 %v1386_v11  ;;  %1282 = vmatpush3.bf16.msra.mxu1 %v1394_v16  ;;  %v304_v11 = vsub.s32 0, %v303_v10 }
  0x42   :  { %1263 = vmatprep.subr.bf16.mxu0 %v1561_v0  ;;  %1283 = vmatprep.subr.bf16.mxu1 %v1561_v0 }
  0x43   :  { %v305_v14 = vrot.slane %v300_v12, %v304_v11 }
  0x45   :  { %1264 = vmatpush3.bf16.msra.mxu0 %v1387_v13  ;;  %1284 = vmatpush3.bf16.msra.mxu1 %v1395_v17  ;;  %v308_v13 = vsub.s32 1, %v303_v10 }
  0x46   :  { %392 = vmatprep.subr.bf16.mxu0 %v1398_v19  ;;  %1191 = vmatprep.subr.bf16.mxu1 %v1420_v43 }
  0x48   :  { %1266 = vmatmul.mubr.bf16.vlgmr.msra.gmra.mxu0 %v55_v15  ;;  %v309_v15 = vrot.slane %v300_v12, %v308_v13  ;;  %v1466_v13 = vld [vmem:[#allocation5 + $0x410] ss:$8 sps:$4 sm:$0xff]  }
  0x49   :  { %393 = vmatpush1.bf16.msra.mxu0 %v1396_v18  ;;  %424 = vmatprep.mubr.bf16.mxu0 %v1563_v42 }
  0x4a   :  { %394 = vmatprep.subr.bf16.mxu0 %v1401_v20 }
  0x4d   :  { %395 = vmatpush1.bf16.msra.mxu0 %v1399_v21 }
  0x4e   :  { %396 = vmatprep.subr.bf16.mxu0 %v1404_v22 }
  0x51   :  { %397 = vmatpush1.bf16.msra.mxu0 %v1402_v23 }
  0x52   :  { %398 = vmatprep.subr.bf16.mxu0 %v1407_v24 }
  0x55   :  { %399 = vmatpush1.bf16.msra.mxu0 %v1405_v25 }
  0x56   :  { %400 = vmatprep.subr.bf16.mxu0 %v1410_v26  ;;  %v1441_v26 = vld [vmem:[#allocation5 + $0x2a0] ss:$8 sps:$4 sm:$0xff]  }
  0x59   :  { %401 = vmatpush1.bf16.msra.mxu0 %v1408_v27  ;;  %v1442_v27 = vld [vmem:[#allocation5 + $0x290] ss:$8 sps:$4 sm:$0xff]  }
  0x5a   :  { %402 = vmatprep.subr.bf16.mxu0 %v1413_v28  ;;  %v1443_v28 = vld [vmem:[#allocation5 + $0x280] ss:$8 sps:$4 sm:$0xff]  }
  0x5d   :  { %403 = vmatpush1.bf16.msra.mxu0 %v1411_v29  ;;  %v1444_v29 = vld [vmem:[#allocation5 + $0x370] ss:$8 sps:$4 sm:$0xff]  }
  0x5e   :  { %404 = vmatprep.subr.bf16.mxu0 %v1416_v30  ;;  %v1445_v30 = vld [vmem:[#allocation5 + $0x360] ss:$8 sps:$4 sm:$0xff]  }
  0x61   :  { %405 = vmatpush1.bf16.msra.mxu0 %v1414_v31  ;;  %v1446_v31 = vld [vmem:[#allocation5 + $0x350] ss:$8 sps:$4 sm:$0xff]  }
  0x62   :  { %406 = vmatprep.subr.bf16.mxu0 %v1419_v40 }
  0x65   :  { %407 = vmatpush1.bf16.msra.mxu0 %v1417_v41 }
  0x66   :  { %1289 = vmatprep.subr.bf16.mxu0 %v1561_v0 }
 0x108   :  { %v161_v33 = vpop.f32.mrf.mxu0 }
 0x109   :  { %v162_v34 = vadd.f32 %v1086_v32, %v161_v33  ;;  %v1447_v32 = vld [vmem:[#allocation5 + $0x340] ss:$8 sps:$4 sm:$0xff]   ;;  %v1448_v33 = vld [vmem:[#allocation5 + $0x330] ss:$8 sps:$4 sm:$0xff]  }
 0x10a   :  { %v1267_v35 = vpop.f32.mrf.mxu0 }
 0x10b   :  { %v167_v36 = vmax.f32 %v162_v34, 0.0  ;;  %v1449_v34 = vld [vmem:[#allocation5 + $0x320] ss:$8 sps:$4 sm:$0xff]  }
 0x10c   :  { %v164_v37 = vpop.f32.mrf.mxu0 }
 0x10d   :  { %v184_v38 = vpack.c.bf16 %v167_v36, %v167_v36  ;;  %v1120_v36 = vld [vmem:[#allocation7 + $0x6] ss:$0 sm:$0xff] }
 0x10e   :  { %v1268_v39 = vpop.f32.mrf.mxu0 }
 0x10f   :  { %1286 = vmatmul.mubr.bf16.vlgmr.msra.gmra.mxu1 %v184_v38 }
 0x110   :  { %1192 = vmatpush3.bf16.msra.mxu1 %v1421_v44  ;;  %v1450_v44 = vld [vmem:[#allocation5 + $0x310] ss:$8 sps:$4 sm:$0xff]  }
 0x111   :  { %1193 = vmatprep.subr.bf16.mxu1 %v1422_v45  ;;  %v1451_v45 = vld [vmem:[#allocation5 + $0x300] ss:$8 sps:$4 sm:$0xff]  }
 0x114   :  { %1194 = vmatpush3.bf16.msra.mxu1 %v1423_v46  ;;  %v1452_v46 = vld [vmem:[#allocation5 + $0x3f0] ss:$8 sps:$4 sm:$0xff]  }
 0x115   :  { %1195 = vmatprep.subr.bf16.mxu1 %v1424_v47  ;;  %v1453_v47 = vld [vmem:[#allocation5 + $0x3e0] ss:$8 sps:$4 sm:$0xff]  }
 0x118   :  { %1196 = vmatpush3.bf16.msra.mxu1 %v1425_v48  ;;  %v1454_v48 = vld [vmem:[#allocation5 + $0x3d0] ss:$8 sps:$4 sm:$0xff]  }
 0x119   :  { %1197 = vmatprep.subr.bf16.mxu1 %v1426_v49  ;;  %v1455_v49 = vld [vmem:[#allocation5 + $0x3c0] ss:$8 sps:$4 sm:$0xff]  }
 0x11c   :  { %1198 = vmatpush3.bf16.msra.mxu1 %v1427_v50  ;;  %v1456_v50 = vld [vmem:[#allocation5 + $0x3b0] ss:$8 sps:$4 sm:$0xff]  }
 0x11d   :  { %1199 = vmatprep.subr.bf16.mxu1 %v1428_v51  ;;  %v1457_v51 = vld [vmem:[#allocation5 + $0x3a0] ss:$8 sps:$4 sm:$0xff]  }
 0x120   :  { %1200 = vmatpush3.bf16.msra.mxu1 %v1429_v52  ;;  %v1137_v52 = vld [vmem:[#allocation7 + $0x8] ss:$0 sm:$0xff] }
 0x121   :  { %1201 = vmatprep.subr.bf16.mxu1 %v1430_v53 }
 0x124   :  { %1202 = vmatpush3.bf16.msra.mxu1 %v1431_v54 }
 0x125   :  { %1203 = vmatprep.subr.bf16.mxu1 %v1432_v63  ;;  %v1461_v63 = vld [vmem:[#allocation5 + $0x460] ss:$8 sps:$4 sm:$0xff]  }
 0x128   :  { %1204 = vmatpush3.bf16.msra.mxu1 %v1433_v1  ;;  %v1462_v1 = vld [vmem:[#allocation5 + $0x450] ss:$8 sps:$4 sm:$0xff]  }
 0x129   :  { %1205 = vmatprep.subr.bf16.mxu1 %v1434_v2  ;;  %v1463_v2 = vld [vmem:[#allocation5 + $0x440] ss:$8 sps:$4 sm:$0xff]  }
 0x12c   :  { %1206 = vmatpush3.bf16.msra.mxu1 %v1435_v3  ;;  %v1464_v3 = vld [vmem:[#allocation5 + $0x430] ss:$8 sps:$4 sm:$0xff]  }
 0x12d   :  { %1309 = vmatprep.subr.bf16.mxu1 %v1561_v0 }
 0x1cf   :  { %v275_v56 = vpop.f32.mrf.mxu1 }
 0x1d0   :  { %v276_v57 = vadd.f32 %v1095_v55, %v275_v56 }
 0x1d1   :  { %v1287_v58 = vpop.f32.mrf.mxu1 }
 0x1d2   :  { %v281_v59 = vmax.f32 %v276_v57, 0.0 }
 0x1d3   :  { %v278_v60 = vpop.f32.mrf.mxu1 }
 0x1d4   :  { %v298_v61 = vpack.c.bf16 %v281_v59, %v281_v59  ;;  %v1458_v60 = vld [vmem:[#allocation5 + $0x390] ss:$8 sps:$4 sm:$0xff]  }
 0x1d5   :  { %v1288_v62 = vpop.f32.mrf.mxu1 }
 0x1d6   :  { %425 = vmatmul.mubr.bf16.vlgmr.msra.gmra.mxu0 %v298_v61  ;;  %v1459_v61 = vld [vmem:[#allocation5 + $0x380] ss:$8 sps:$4 sm:$0xff]   ;;  %v1460_v62 = vld [vmem:[#allocation5 + $0x470] ss:$8 sps:$4 sm:$0xff]  }
 0x1d7   :  { %1305 = vmatprep.mubr.msk.bf16.mxu0 %vm1562_vm0, %v1561_v0  ;;  %1290 = vmatpush3.bf16.msra.mxu0 %v1436_v4  ;;  %v1465_v4 = vld [vmem:[#allocation5 + $0x420] ss:$8 sps:$4 sm:$0xff]  }
 0x1d8   :  { %1291 = vmatprep.subr.bf16.mxu0 %v1561_v0 }
 0x1db   :  { %1292 = vmatpush3.bf16.msra.mxu0 %v1437_v5  ;;  %v1146_v5 = vld [vmem:[#allocation7 + $0xa] ss:$0 sm:$0xff] }
 0x1dc   :  { %1293 = vmatprep.subr.bf16.mxu0 %v1561_v0 }
 0x1df   :  { %1294 = vmatpush3.bf16.msra.mxu0 %v1438_v6 }
 0x1e0   :  { %1295 = vmatprep.subr.bf16.mxu0 %v1561_v0 }
 0x1e3   :  { %1296 = vmatpush3.bf16.msra.mxu0 %v1439_v7 }
 0x1e4   :  { %1297 = vmatprep.subr.bf16.mxu0 %v1561_v0 }
 0x1e7   :  { %1298 = vmatpush3.bf16.msra.mxu0 %v1440_v8 }
 0x1e8   :  { %1299 = vmatprep.subr.bf16.mxu0 %v1561_v0 }
 0x1eb   :  { %1300 = vmatpush3.bf16.msra.mxu0 %v1441_v26 }
 0x1ec   :  { %1301 = vmatprep.subr.bf16.mxu0 %v1561_v0 }
 0x1ef   :  { %1302 = vmatpush3.bf16.msra.mxu0 %v1442_v27 }
 0x1f0   :  { %1303 = vmatprep.subr.bf16.mxu0 %v1561_v0 }
 0x1f3   :  { %1304 = vmatpush3.bf16.msra.mxu0 %v1443_v28 }
 0x1f4   :  { %1329 = vmatprep.subr.bf16.mxu0 %v1561_v0 }
 0x296   :  { %v426_v16 = vpop.f32.mrf.mxu0 }
 0x297   :  { %v427_v17 = vadd.f32 %v426_v16, %v305_v14  ;;  %v1467_v14 = vld [vmem:[#allocation5 + $0x400] ss:$8 sps:$4 sm:$0xff]  }
 0x298   :  { %v428_v18 = vpop.f32.mrf.mxu0 }
 0x299   :  { %v429_v19 = vadd.f32 %v428_v18, %v309_v15  ;;  %v433_v20 = vmax.f32 %v427_v17, 0.0  ;;  %v1155_v15 = vld [vmem:[#allocation7 + $0xc] ss:$0 sm:$0xff] }
 0x29a   :  { %v430_v21 = vpop.f32.mrf.mxu0 }
 0x29b   :  { %v434_v22 = vmax.f32 %v429_v19, 0.0  ;;  %v467_v25 = vpack.c.bf16 %v433_v20, %v433_v20 }
 0x29c   :  { %v431_v23 = vpop.f32.mrf.mxu0 }
 0x29d   :  { %v468_v24 = vpack.c.bf16 %v434_v22, %v434_v22  ;;  %v1164_v23 = vld [vmem:[#allocation7 + $0xe] ss:$0 sm:$0xff] }
 0x29f   :  { %605 = vmatprep.mubr.bf16.mxu1 %v468_v24 }
 0x2a0   :  { %606 = vmatmul.mubr.bf16.vlgmr.msra.gmra.mxu1 %v467_v25 }
 0x2a1   :  { %1325 = vmatprep.mubr.msk.bf16.mxu1 %vm1562_vm0, %v1561_v0  ;;  %1310 = vmatpush3.bf16.msra.mxu1 %v1444_v29 }
 0x2a2   :  { %1311 = vmatprep.subr.bf16.mxu1 %v1561_v0 }
 0x2a5   :  { %1312 = vmatpush3.bf16.msra.mxu1 %v1445_v30 }
 0x2a6   :  { %1313 = vmatprep.subr.bf16.mxu1 %v1561_v0 }
 0x2a9   :  { %1314 = vmatpush3.bf16.msra.mxu1 %v1446_v31 }
 0x2aa   :  { %1315 = vmatprep.subr.bf16.mxu1 %v1561_v0 }
 0x2ad   :  { %1316 = vmatpush3.bf16.msra.mxu1 %v1447_v32 }
 0x2ae   :  { %1317 = vmatprep.subr.bf16.mxu1 %v1561_v0 }
 0x2b1   :  { %1318 = vmatpush3.bf16.msra.mxu1 %v1448_v33 }
 0x2b2   :  { %1319 = vmatprep.subr.bf16.mxu1 %v1561_v0 }
 0x2b5   :  { %1320 = vmatpush3.bf16.msra.mxu1 %v1449_v34 }
 0x2b6   :  { %1321 = vmatprep.subr.bf16.mxu1 %v1561_v0 }
 0x2b9   :  { %1322 = vmatpush3.bf16.msra.mxu1 %v1450_v44 }
 0x2ba   :  { %1323 = vmatprep.subr.bf16.mxu1 %v1561_v0 }
 0x2bd   :  { %1324 = vmatpush3.bf16.msra.mxu1 %v1451_v45 }
 0x2be   :  { %1349 = vmatprep.subr.bf16.mxu1 %v1561_v0 }
 0x360   :  { %v1207_v35 = vpop.f32.mrf.mxu1 }
 0x362   :  { %v1208_v37 = vpop.f32.mrf.mxu1 }
 0x363   :  { %v1209_v38 = vadd.f32 %v1208_v37, %v1207_v35 }
 0x364   :  { %v1210_v39 = vpop.f32.mrf.mxu1 }
 0x365   :  { %v608_v40 = vadd.f32 %v1209_v38, %v1120_v36 }
 0x366   :  { %v1211_v41 = vpop.f32.mrf.mxu1 }
 0x367   :  { %v613_v42 = vmax.f32 %v608_v40, 0.0 }
 0x369   :  { %v630_v43 = vpack.c.bf16 %v613_v42, %v613_v42 }
 0x36b   :  { %1306 = vmatmul.mubr.bf16.vlgmr.msra.gmra.mxu0 %v630_v43 }
 0x36c   :  { %1345 = vmatprep.mubr.msk.bf16.mxu0 %vm1562_vm0, %v1561_v0  ;;  %1330 = vmatpush3.bf16.msra.mxu0 %v1452_v46 }
 0x36d   :  { %1331 = vmatprep.subr.bf16.mxu0 %v1561_v0 }
 0x370   :  { %1332 = vmatpush3.bf16.msra.mxu0 %v1453_v47 }
 0x371   :  { %1333 = vmatprep.subr.bf16.mxu0 %v1561_v0 }
 0x374   :  { %1334 = vmatpush3.bf16.msra.mxu0 %v1454_v48 }
 0x375   :  { %1335 = vmatprep.subr.bf16.mxu0 %v1561_v0 }
 0x378   :  { %1336 = vmatpush3.bf16.msra.mxu0 %v1455_v49 }
 0x379   :  { %1337 = vmatprep.subr.bf16.mxu0 %v1561_v0 }
 0x37c   :  { %1338 = vmatpush3.bf16.msra.mxu0 %v1456_v50 }
 0x37d   :  { %1339 = vmatprep.subr.bf16.mxu0 %v1561_v0 }
 0x380   :  { %1340 = vmatpush3.bf16.msra.mxu0 %v1457_v51 }
 0x381   :  { %1341 = vmatprep.subr.bf16.mxu0 %v1561_v0 }
 0x384   :  { %1342 = vmatpush3.bf16.msra.mxu0 %v1458_v60 }
 0x385   :  { %1343 = vmatprep.subr.bf16.mxu0 %v1561_v0 }
 0x388   :  { %1344 = vmatpush3.bf16.msra.mxu0 %v1459_v61 }
 0x42b   :  { %v721_v53 = vpop.f32.mrf.mxu0 }
 0x42c   :  { %v722_v54 = vadd.f32 %v1137_v52, %v721_v53 }
 0x42d   :  { %v1307_v55 = vpop.f32.mrf.mxu0 }
 0x42e   :  { %v727_v56 = vmax.f32 %v722_v54, 0.0 }
 0x42f   :  { %v724_v57 = vpop.f32.mrf.mxu0 }
 0x430   :  { %v744_v58 = vpack.c.bf16 %v727_v56, %v727_v56 }
 0x431   :  { %v1308_v59 = vpop.f32.mrf.mxu0 }
 0x432   :  { %1326 = vmatmul.mubr.bf16.vlgmr.msra.gmra.mxu1 %v744_v58 }
 0x433   :  { %1365 = vmatprep.mubr.msk.bf16.mxu1 %vm1562_vm0, %v1561_v0  ;;  %1350 = vmatpush3.bf16.msra.mxu1 %v1460_v62 }
 0x434   :  { %1351 = vmatprep.subr.bf16.mxu1 %v1561_v0 }
 0x437   :  { %1352 = vmatpush3.bf16.msra.mxu1 %v1461_v63 }
 0x438   :  { %1353 = vmatprep.subr.bf16.mxu1 %v1561_v0 }
 0x43b   :  { %1354 = vmatpush3.bf16.msra.mxu1 %v1462_v1 }
 0x43c   :  { %1355 = vmatprep.subr.bf16.mxu1 %v1561_v0 }
 0x43f   :  { %1356 = vmatpush3.bf16.msra.mxu1 %v1463_v2 }
 0x440   :  { %1357 = vmatprep.subr.bf16.mxu1 %v1561_v0 }
 0x443   :  { %1358 = vmatpush3.bf16.msra.mxu1 %v1464_v3 }
 0x444   :  { %1359 = vmatprep.subr.bf16.mxu1 %v1561_v0 }
 0x447   :  { %1360 = vmatpush3.bf16.msra.mxu1 %v1465_v4 }
 0x448   :  { %1361 = vmatprep.subr.bf16.mxu1 %v1561_v0 }
 0x44b   :  { %1362 = vmatpush3.bf16.msra.mxu1 %v1466_v13 }
 0x44c   :  { %1363 = vmatprep.subr.bf16.mxu1 %v1561_v0 }
 0x44f   :  { %1364 = vmatpush3.bf16.msra.mxu1 %v1467_v14 }
 0x4f2   :  { %v835_v6 = vpop.f32.mrf.mxu1 }
 0x4f3   :  { %v836_v7 = vadd.f32 %v1146_v5, %v835_v6 }
 0x4f4   :  { %v1327_v8 = vpop.f32.mrf.mxu1 }
 0x4f5   :  { %v841_v9 = vmax.f32 %v836_v7, 0.0 }
 0x4f6   :  { %v838_v10 = vpop.f32.mrf.mxu1 }
 0x4f7   :  { %v858_v11 = vpack.c.bf16 %v841_v9, %v841_v9 }
 0x4f8   :  { %v1328_v12 = vpop.f32.mrf.mxu1 }
 0x4f9   :  { %1346 = vmatmul.mubr.bf16.vlgmr.msra.gmra.mxu0 %v858_v11 }
 0x5b9   :  { %v949_v16 = vpop.f32.mrf.mxu0 }
 0x5ba   :  { %v950_v17 = vadd.f32 %v1155_v15, %v949_v16 }
 0x5bb   :  { %v1347_v18 = vpop.f32.mrf.mxu0 }
 0x5bc   :  { %v955_v19 = vmax.f32 %v950_v17, 0.0 }
 0x5bd   :  { %v952_v20 = vpop.f32.mrf.mxu0 }
 0x5be   :  { %v972_v21 = vpack.c.bf16 %v955_v19, %v955_v19 }
 0x5bf   :  { %v1348_v22 = vpop.f32.mrf.mxu0 }
 0x5c0   :  { %1366 = vmatmul.mubr.bf16.vlgmr.msra.gmra.mxu1 %v972_v21 }
 0x680   :  { %v1063_v24 = vpop.f32.mrf.mxu1 }
 0x681   :  { %v1064_v25 = vadd.f32 %v1164_v23, %v1063_v24 }
 0x682   :  { %v1367_v26 = vpop.f32.mrf.mxu1 }
 0x683   :  { %1069 = vst [vmem:[#allocation8] sm:$0xff] %v1064_v25 }
 0x684   :  { %v1066_v0 = vpop.f32.mrf.mxu1 }
 0x685   :  { %1539 = shalt.err (!%p1536_p5)
}
 0x686   :  { %1079 = dma.vmem_to_hbm [thread:$0]  %s1077_s2, 128, %s1660_s3, [#allocation4]   ;;  %v1368_v27 = vpop.f32.mrf.mxu1 }
 0x687   :  { %1552 = dma.done.wait [#allocation4], 128  }
 0x688   :  { %1553 = vsyncadd [#allocation4], 4294967168 }
 0x689   :  { %1083 = vsyncpa [#allocation3], 1 }
 0x68a   :  { %1084 = vsyncpa [#allocation6], 1 }
 0x68b   :  { %1085 = vsyncpa [#allocation4], 1 }

</bundles_post_ra>
